<compile_context>
chip_gen: v7x
topology: tpu7x:2x2x1
jax: 0.10.0
libtpu: 0.0.40
codegen_flags: <defaults>
</compile_context>

<pallas_src>
import functools

import jax
import jax.numpy as jnp
from jax import lax
from jax.experimental import pallas as pl
from jax.experimental.pallas import tpu as pltpu


_CHUNK_BYTES = 1 << 20     # ~1 MiB of f32 per in-kernel compute chunk
_BLOCK_BYTES = 12 << 20    # ~12 MiB per DMA block (double-buffered by Pallas)


def _num_tensorcores():
    """Best-effort TensorCores-per-chip query (v7x has 2); fall back to 1."""
    try:
        info = pltpu.get_tpu_info()
        for name in ("num_cores", "core_count", "num_tensorcores",
                     "tensorcores_per_chip"):
            v = getattr(info, name, None)
            if isinstance(v, int) and v > 0:
                return max(1, min(2, v))
    except Exception:
        pass
    try:
        v = getattr(jax.devices()[0], "num_cores", None)
        if isinstance(v, int) and v > 0:
            return max(1, min(2, v))
    except Exception:
        pass
    return 1


def _plan(n_rows, n_lanes, itemsize, block_rows=None, chunk_rows=None):
    """Pick (block_rows, chunk_rows).

    block = rows per DMA tile (large, amortizes per-grid-step overhead).
    chunk = rows per in-kernel compute slice (bounds f32 temporary VMEM).
    Invariants: chunk % sublane_align == 0 (unless it covers all rows),
    block % chunk == 0, block <= n_rows (so no block starts past the array).
    """
    align = 16 if itemsize == 2 else 8

    def _down(v, m):
        return max(m, (int(v) // m) * m)

    rc = chunk_rows if chunk_rows is not None else _CHUNK_BYTES // (4 * n_lanes)
    rc = _down(rc, align)
    if n_rows <= rc:
        return n_rows, n_rows                       # single tile, single chunk

    bm = block_rows if block_rows is not None else _BLOCK_BYTES // (n_lanes * itemsize)
    bm = _down(bm, rc)
    bm = min(bm, _down(n_rows, rc))                 # every block start stays < n_rows
    return bm, rc


def _cml_partial_kernel(x_ref, o_ref, acc_ref, *, rows_total, slot_period,
                        chunk_rows, num_chunks, tiles_per_split):
    s = pl.program_id(0)
    i = pl.program_id(1)

    @pl.when(i == 0)
    def _init():
        acc_ref[...] = jnp.zeros_like(acc_ref)

    tm, n_lanes = x_ref.shape

    # Row offset of this tile in the *unclamped* tiling.  Overhang tiles created
    # by the parallel split, and the ragged rows of the true last tile, land at
    # row >= rows_total and are masked out of the sum below.
    tile_row0 = (s * tiles_per_split + i) * tm

    def chunk_body(c, carry):
        r0 = pl.multiple_of(c * chunk_rows, chunk_rows)
        xb = x_ref[pl.ds(r0, chunk_rows), :].astype(jnp.float32)    # (rc, L)

        # Lane-neighbour view: nb[l] = xb[l + 1]  (roll by L-1 == shift -1).
        # On slot-0 lanes this pairs (anchor, positive); on slot-1 lanes it
        # pairs (positive, negative); all other lanes are ignored via the mask.
        nb = pltpu.roll(xb, n_lanes - 1, axis=1)
        d = xb - nb
        sq = d * d

        lane = lax.broadcasted_iota(jnp.int32, (chunk_rows, n_lanes), 1)
        slot = lane % slot_period
        row = tile_row0 + r0 + lax.broadcasted_iota(
            jnp.int32, (chunk_rows, n_lanes), 0)
        row_ok = row < rows_total

        pos = jnp.where(row_ok & (slot == 0), sq, 0.0)   # (anchor - positive)^2
        neg = jnp.where(row_ok & (slot == 1), sq, 0.0)   # (positive - negative)^2
        # Sublane-only reduction per chunk; lane-wide f32 accumulator.
        acc_ref[...] += jnp.sum(pos - neg, axis=0, keepdims=True)
        return carry

    lax.fori_loop(0, num_chunks, chunk_body, 0)

    @pl.when(i == pl.num_programs(1) - 1)
    def _finalize():
        # Single cross-lane reduce at the end of this split's row range.
        o_ref[...] = jnp.sum(acc_ref[...], axis=1, keepdims=True)[None]


def cml_loss(x, margin=10.0, *, block_rows=None, chunk_rows=None, n_split=None):
    """x: (B, N, K>=3). Returns scalar f32 = relu(mean((a-p)^2) - mean((p-n)^2) + margin)."""
    B, N, K = x.shape
    assert K >= 3, "last dim must hold [anchor, positive, negative] slots"

    if x.dtype not in (jnp.float32, jnp.bfloat16):
        x = x.astype(jnp.float32)
    itemsize = jnp.dtype(x.dtype).itemsize

    # Free, layout-preserving view: (B, N, K) -> (B, N*K).  Slots stay
    # interleaved along the lane axis and are separated in-kernel.
    L = N * K
    x2d = x.reshape(B, L)

    tm, rc = _plan(B, L, itemsize, block_rows, chunk_rows)
    n_tiles = -(-B // tm)
    if n_split is None:
        n_split = _num_tensorcores()
    n_split = max(1, min(int(n_split), n_tiles))
    tiles_per_split = -(-n_tiles // n_split)

    kernel = functools.partial(
        _cml_partial_kernel,
        rows_total=B,
        slot_period=K,
        chunk_rows=rc,
        num_chunks=tm // rc,
        tiles_per_split=tiles_per_split,
    )

    partials = pl.pallas_call(
        kernel,
        out_shape=jax.ShapeDtypeStruct((n_split, 1, 1), jnp.float32),
        grid=(n_split, tiles_per_split),
        in_specs=[
            pl.BlockSpec(
                (tm, L),
                # Clamp so overhang tiles re-read the last valid block (their
                # rows are masked in-kernel); never issues a fully-OOB DMA.
                lambda s, i: (jnp.minimum(s * tiles_per_split + i, n_tiles - 1), 0),
            ),
        ],
        out_specs=pl.BlockSpec((1, 1, 1), lambda s, i: (s, 0, 0)),
        scratch_shapes=[pltpu.VMEM((1, L), jnp.float32)],
        compiler_params=pltpu.CompilerParams(
            dimension_semantics=("parallel", "arbitrary"),
            vmem_limit_bytes=48 * 1024 * 1024,
        ),
    )(x2d)

    # mean / margin / relu once, on the accumulated partial sums.
    total = jnp.sum(partials)
    loss = total / jnp.float32(B * N) + jnp.float32(margin)
    return jnp.maximum(loss, jnp.float32(0.0))


def cml_loss_ref(x, margin=10.0):
    x = x.astype(jnp.float32)
    pos = jnp.mean((x[:, :, 0] - x[:, :, 1]) ** 2)
    neg = jnp.mean((x[:, :, 1] - x[:, :, 2]) ** 2)
    return jnp.maximum(pos - neg + margin, 0.0)


if __name__ == "__main__":
    key = jax.random.PRNGKey(0)
    k1, k2, k3, k4 = jax.random.split(key, 4)

    # 1) Simple single-tile / single-chunk path.
    x1 = jax.random.normal(k1, (8, 128, 3), dtype=jnp.float32)
    out1 = jax.block_until_ready(cml_loss(x1))
    ref1 = jax.block_until_ready(cml_loss_ref(x1))
    assert jnp.allclose(out1, ref1, rtol=1e-5, atol=1e-5), (out1, ref1)

    # 2) Multi-tile, ragged last tile, forced 2-way split (overhang tile),
    #    and the in-kernel chunk loop.
    x2 = jax.random.normal(k2, (72, 256, 3), dtype=jnp.float32)
    out2 = jax.block_until_ready(
        cml_loss(x2, block_rows=32, chunk_rows=16, n_split=2))
    ref2 = jax.block_until_ready(cml_loss_ref(x2))
    assert jnp.allclose(out2, ref2, rtol=1e-5, atol=1e-5), (out2, ref2)

    # 3) bf16 inputs (half the HBM bytes); accumulation stays f32.
    x3 = jax.random.normal(k3, (64, 128, 3), dtype=jnp.float32).astype(jnp.bfloat16)
    out3 = jax.block_until_ready(cml_loss(x3, block_rows=32, chunk_rows=16))
    ref3 = jax.block_until_ready(cml_loss_ref(x3))
    assert jnp.allclose(out3, ref3, rtol=1e-4, atol=1e-4), (out3, ref3)

    # 4) K > 3: trailing slots ignored, matching x[:, :, 0/1/2] in the module.
    x4 = jax.random.normal(k4, (16, 128, 4), dtype=jnp.float32)
    out4 = jax.block_until_ready(cml_loss(x4))
    ref4 = jax.block_until_ready(cml_loss_ref(x4))
    assert jnp.allclose(out4, ref4, rtol=1e-5, atol=1e-5), (out4, ref4)

    print("KERNEL_OK")
</pallas_src>

<mosaic_0001>
module attributes {stable_mosaic.version = 11 : i64} {
  func.func @_cml_partial_kernel(%arg0: i32, %arg1: i32, %arg2: memref<8x384xf32, #tpu.memory_space<vmem>>, %arg3: memref<1x1x1xf32, #tpu.memory_space<vmem>>, %arg4: memref<1x384xf32, #tpu.memory_space<vmem>>) attributes {dimension_semantics = [#tpu.dimension_semantics<parallel>, #tpu.dimension_semantics<arbitrary>], iteration_bounds = array<i64: 1, 1>, scalar_prefetch = 0 : i64, scratch_operands = 1 : i64, tpu.core_type = #tpu.core_type<tc>, window_params = [{transform_indices = @transform_0, window_bounds = array<i64: 8, 384>}, {transform_indices = @transform_1, window_bounds = array<i64: 1, 1, 1>}]} {
    %c0_i32 = arith.constant 0 : i32
    %0 = arith.cmpi eq, %arg1, %c0_i32 : i32
    %1 = arith.extui %0 : i1 to i32
    %c0_i32_0 = arith.constant 0 : i32
    %2 = arith.cmpi ne, %1, %c0_i32_0 : i32
    scf.if %2 {
      %cst_20 = arith.constant 0.000000e+00 : f32
      %55 = vector.broadcast %cst_20 : f32 to vector<1x384xf32>
      %c0_21 = arith.constant 0 : index
      %c0_22 = arith.constant 0 : index
      %56 = vector.load %arg4[%c0_21, %c0_22] : memref<1x384xf32, #tpu.memory_space<vmem>>, vector<1x384xf32>
      tpu.vector_store %arg4[%c0_21, %c0_22], %55 {strides = array<i32>} : memref<1x384xf32, #tpu.memory_space<vmem>>, vector<1x384xf32>,
    } else {
    }
    %c1_i32 = arith.constant 1 : i32
    %3 = arith.muli %arg0, %c1_i32 : i32
    %4 = arith.addi %3, %arg1 : i32
    %c8_i32 = arith.constant 8 : i32
    %5 = arith.muli %4, %c8_i32 : i32
    %c0_i32_1 = arith.constant 0 : i32
    %c8_i32_2 = arith.constant 8 : i32
    %6 = arith.muli %c0_i32_1, %c8_i32_2 : i32
    %7 = tpu.assume_multiple %6, 8 : i32
    %8 = arith.index_cast %7 : i32 to index
    %c0 = arith.constant 0 : index
    %9 = vector.load %arg2[%8, %c0] : memref<8x384xf32, #tpu.memory_space<vmem>>, vector<8x384xf32>
    %c383_i32 = arith.constant 383 : i32
    %10 = tpu.dynamic_rotate %9 by %c383_i32 dim 1 : vector<8x384xf32>, i32 -> vector<8x384xf32>
    %11 = arith.subf %9, %10 : vector<8x384xf32>
    %12 = arith.mulf %11, %11 : vector<8x384xf32>
    %13 = tpu.iota {dimensions = array<i32: 1>} : vector<8x384xi32>
    %c3_i32 = arith.constant 3 : i32
    %c0_i32_3 = arith.constant 0 : i32
    %14 = arith.cmpi eq, %c3_i32, %c0_i32_3 : i32
    %c1_i32_4 = arith.constant 1 : i32
    %15 = arith.select %14, %c1_i32_4, %c3_i32 : i32
    %16 = vector.broadcast %15 : i32 to vector<8x384xi32>
    %17 = arith.remsi %13, %16 : vector<8x384xi32>
    %c0_i32_5 = arith.constant 0 : i32
    %18 = vector.broadcast %c0_i32_5 : i32 to vector<8x384xi32>
    %19 = arith.cmpi ne, %17, %18 : vector<8x384xi32>
    %c0_i32_6 = arith.constant 0 : i32
    %20 = vector.broadcast %c0_i32_6 : i32 to vector<8x384xi32>
    %21 = arith.cmpi slt, %17, %20 : vector<8x384xi32>
    %c0_i32_7 = arith.constant 0 : i32
    %22 = arith.cmpi slt, %15, %c0_i32_7 : i32
    %23 = vector.broadcast %22 : i1 to vector<8x384xi1>
    %24 = vector.broadcast %23 : vector<8x384xi1> to vector<8x384xi1>
    %25 = arith.xori %21, %24 : vector<8x384xi1>
    %26 = arith.andi %25, %19 : vector<8x384xi1>
    %27 = vector.broadcast %15 : i32 to vector<8x384xi32>
    %28 = arith.addi %17, %27 : vector<8x384xi32>
    %29 = arith.select %26, %28, %17 : vector<8x384xi1>, vector<8x384xi32>
    %30 = arith.addi %5, %7 : i32
    %31 = tpu.iota {dimensions = array<i32: 0>} : vector<8x384xi32>
    %32 = vector.broadcast %30 : i32 to vector<8x384xi32>
    %33 = arith.addi %32, %31 : vector<8x384xi32>
    %c8_i32_8 = arith.constant 8 : i32
    %34 = vector.broadcast %c8_i32_8 : i32 to vector<8x384xi32>
    %35 = arith.cmpi slt, %33, %34 : vector<8x384xi32>
    %c0_i32_9 = arith.constant 0 : i32
    %36 = vector.broadcast %c0_i32_9 : i32 to vector<8x384xi32>
    %37 = arith.cmpi eq, %29, %36 : vector<8x384xi32>
    %38 = arith.andi %35, %37 : vector<8x384xi1>
    %cst = arith.constant 0.000000e+00 : f32
    %39 = vector.broadcast %cst : f32 to vector<8x384xf32>
    %40 = arith.select %38, %12, %39 : vector<8x384xi1>, vector<8x384xf32>
    %c1_i32_10 = arith.constant 1 : i32
    %41 = vector.broadcast %c1_i32_10 : i32 to vector<8x384xi32>
    %42 = arith.cmpi eq, %29, %41 : vector<8x384xi32>
    %43 = arith.andi %35, %42 : vector<8x384xi1>
    %cst_11 = arith.constant 0.000000e+00 : f32
    %44 = vector.broadcast %cst_11 : f32 to vector<8x384xf32>
    %45 = arith.select %43, %12, %44 : vector<8x384xi1>, vector<8x384xf32>
    %c0_12 = arith.constant 0 : index
    %c0_13 = arith.constant 0 : index
    %46 = vector.load %arg4[%c0_12, %c0_13] : memref<1x384xf32, #tpu.memory_space<vmem>>, vector<1x384xf32>
    %47 = arith.subf %40, %45 : vector<8x384xf32>
    %cst_14 = arith.constant dense<0.000000e+00> : vector<384xf32>
    %48 = vector.multi_reduction <add>, %47, %cst_14 [0] : vector<8x384xf32> to vector<384xf32>
    %49 = vector.shape_cast %48 : vector<384xf32> to vector<1x384xf32>
    %50 = arith.addf %46, %49 : vector<1x384xf32>
    %c0_15 = arith.constant 0 : index
    %c0_16 = arith.constant 0 : index
    %51 = vector.load %arg4[%c0_15, %c0_16] : memref<1x384xf32, #tpu.memory_space<vmem>>, vector<1x384xf32>
    tpu.vector_store %arg4[%c0_15, %c0_16], %50 {strides = array<i32>} : memref<1x384xf32, #tpu.memory_space<vmem>>, vector<1x384xf32>,
    %c1_i32_17 = arith.constant 1 : i32
    %c0_i32_18 = arith.constant 0 : i32
    %52 = arith.cmpi eq, %arg1, %c0_i32_18 : i32
    %53 = arith.extui %52 : i1 to i32
    %c0_i32_19 = arith.constant 0 : i32
    %54 = arith.cmpi ne, %53, %c0_i32_19 : i32
    scf.if %54 {
      %c0_20 = arith.constant 0 : index
      %c0_21 = arith.constant 0 : index
      %55 = vector.load %arg4[%c0_20, %c0_21] : memref<1x384xf32, #tpu.memory_space<vmem>>, vector<1x384xf32>
      %cst_22 = arith.constant dense<0.000000e+00> : vector<1xf32>
      %56 = vector.multi_reduction <add>, %55, %cst_22 [1] : vector<1x384xf32> to vector<1xf32>
      %57 = vector.shape_cast %56 : vector<1xf32> to vector<1x1xf32>
      %58 = vector.shape_cast %57 : vector<1x1xf32> to vector<1x1x1xf32>
      %c0_23 = arith.constant 0 : index
      %c0_24 = arith.constant 0 : index
      %c0_25 = arith.constant 0 : index
      %59 = vector.load %arg3[%c0_23, %c0_24, %c0_25] : memref<1x1x1xf32, #tpu.memory_space<vmem>>, vector<1x1x1xf32>
      tpu.vector_store %arg3[%c0_23, %c0_24, %c0_25], %58 {strides = array<i32>} : memref<1x1x1xf32, #tpu.memory_space<vmem>>, vector<1x1x1xf32>,
    } else {
    }
    return
  }
  func.func @transform_0(%arg0: i32, %arg1: i32) -> (i32, i32) {
    %c1_i32 = arith.constant 1 : i32
    %0 = arith.muli %arg0, %c1_i32 : i32
    %1 = arith.addi %0, %arg1 : i32
    %c0_i32 = arith.constant 0 : i32
    %2 = arith.minsi %1, %c0_i32 : i32
    %c0_i32_0 = arith.constant 0 : i32
    %c0_i32_1 = arith.constant 0 : i32
    return %2, %c0_i32_0 : i32, i32
  }
  func.func @transform_1(%arg0: i32, %arg1: i32) -> (i32, i32, i32) {
    %c0_i32 = arith.constant 0 : i32
    %c0_i32_0 = arith.constant 0 : i32
    %c0_i32_1 = arith.constant 0 : i32
    return %arg0, %c0_i32, %c0_i32_0 : i32, i32, i32
  }
}

</mosaic_0001>

<bundles_post_ra>
// kernel: tpu_custom_call.1
= control target key start
LH: loop header
LB: loop body
LE: loop exit
PB: predicated region body
PF: predicated region fallthrough
CT: control target
= control target key end

     0   :  { %6 = vsyncpa [#allocation4], 0  ;;  %s365_s0 = inlined_call_operand.hbm [shape: f32[8,384], index: 0, kind: input, shape index: {}]   ;;  %s366_s1 = inlined_call_operand.hbm [shape: f32[1,1,1], index: 1, kind: output, shape index: {}]  }
   0x1   :  { %7 = vsyncpa [#allocation5], 0  ;;  %s300_s6 = smov [#allocation3]   ;;  %s252_s10 = scalar_lea.hbm %s365_s0, 384 }
   0x2   :  { %s20_s7 = sshll.u32 %s300_s6, 4  ;;  %p253_p0 = scmp.ne.s32.totalorder %s365_s0, %s252_s10  ;;  %s21_s7 = int_to_ptr.vmem [resolvable:$true] %s20_s7 }
   0x3   :  { %p256_p1 = scmp.lt.u32.totalorder %s252_s10, %s365_s0 }
   0x5   :  { %p258_p2 = pnand %p256_p1, %p253_p0 }
   0x7   :  { %261 = shalt.err (!%p258_p2)
}
   0x8   :  { %s262_s15 = scalar_lea.vmem %s21_s7, 384  ;;  %p267_p4 = scmp.lt.s32.totalorder %s21_s7, %s21_s7 }
   0x9   :  { %p263_p3 = scmp.ne.s32.totalorder %s21_s7, %s262_s15  ;;  %p268_p5 = scmp.lt.s32.totalorder %s262_s15, %s262_s15 }
   0xb   :  { %p269_p6 = por %p268_p5, %p267_p4 }
   0xd   :  { %p270_p7 = pnand %p269_p6, %p263_p3 }
   0xf   :  { %273 = shalt.err (!%p270_p7)
}
  0x10   :  { %23 = dma.hbm_to_vmem [thread:$0]  %s365_s0, 384, %s21_s7, [#allocation4]  }
  0x11   :  { %296 = dma.done.wait [#allocation4], 384  }
  0x12   :  { %297 = vsyncadd [#allocation4], 4294966912  ;;  %v34_v0 = vlaneseq  ;;  %v301_v2 = vmov 0.0   ;;  %v46_v3 = vld [vmem:[#allocation3 + $0x10] sm:$0xff]  ;;  %v44_v4 = vld [vmem:[#allocation3] sm:$0xff]  ;;  %s302_s18 = smov 127  }
  0x13   :  { %51 = vrot.lane.b32.xlu1 %v46_v3, %s302_s18  ;;  %47 = vrot.lane.b32.xlu0 %v44_v4, %s302_s18  ;;  %v45_v5 = vld [vmem:[#allocation3 + $0x8] sm:$0xff]  ;;  %v303_v56 = vmov 1966171168   ;;  %s304_s0 = smov [#allocation6]  }
  0x14   :  { %vm328_vm0 = vcmp.lt.s32.totalorder %v34_v0, 384  ;;  %v54_v6 = vand.u32 127, %v34_v0  ;;  %v166_v57 = vunpack.c.l.s4 %v303_v56  ;;  %v169_v63 = vshrl.u32 %v34_v0, 7  ;;  %s230_s19 = sshll.u32 %s304_s0, 4  ;;  %s231_s19 = int_to_ptr.vmem [resolvable:$true] %s230_s19 }
  0x15   :  { %38 = vst.msk [vmem:[#allocation2] sm:$0x7] %vm328_vm0, %v301_v2  ;;  %s274_s20 = scalar_lea.vmem %s231_s19, 16  ;;  %s278_s21 = scalar_lea.vmem %s231_s19, 32 }
  0x16   :  { %v66_v7 = vadd.s32 256, %v54_v6  ;;  %v65_v10 = vadd.s32 128, %v54_v6  ;;  %v338_v11 = vmul.u32.u64.low 2863311531, %v54_v6  ;;  %v339_v12 = vmul.u32.u64.high 2863311531, %v54_v6, %v338_v11  ;;  %p275_p8 = scmp.ne.s32.totalorder %s231_s19, %s274_s20  ;;  %p279_p9 = scmp.lt.s32.totalorder %s231_s19, %s231_s19 }
  0x17   :  { %49 = vrot.lane.b32.xlu0 %v45_v5, %s302_s18  ;;  %vm55_vm6 = vcmp.lt.s32.totalorder %v54_v6, 127  ;;  %v167_v2 = vunpack.c.0.s8 %v166_v57  ;;  %v201_v0 = vsub.s32 0, %v169_v63  ;;  %p280_p10 = scmp.lt.s32.totalorder %s278_s21, %s274_s20 }
  0x18   :  { %v335_v8 = vmul.u32.u64.low 2863311531, %v66_v7  ;;  %v336_v9 = vmul.u32.u64.high 2863311531, %v66_v7, %v335_v8  ;;  %v341_v13 = vmul.u32.u64.low 2863311531, %v65_v10  ;;  %v342_v14 = vmul.u32.u64.high 2863311531, %v65_v10, %v341_v13 }
  0x19   :  { %v73_v16 = vshrl.u32 %v339_v12, 1  ;;  %v170_v8 = vsub.s32 %v167_v2, %v169_v63  ;;  %p281_p11 = por %p280_p10, %p279_p9 }
  0x1a   :  { %v95_v15 = vshrl.u32 %v336_v9, 1  ;;  %v84_v18 = vshrl.u32 %v342_v14, 1 }
  0x1b   :  { %v74_v19 = vmul.u32 3, %v73_v16  ;;  %p282_p12 = pnand %p281_p11, %p275_p8 }
  0x1c   :  { %v96_v17 = vmul.u32 3, %v95_v15  ;;  %v85_v21 = vmul.u32 3, %v84_v18  ;;  %v139_v16 = vld [vmem:[#allocation2] sm:$0x7] }
  0x1d   :  { %v75_v22 = vsub.s32 %v54_v6, %v74_v19  ;;  %v205_v19 = vsub.s32 1, %v169_v63 }
  0x1e   :  { %v97_v20 = vsub.s32 %v66_v7, %v96_v17  ;;  %v86_v23 = vsub.s32 %v65_v10, %v85_v21 }
  0x1f   :  { %vm100_vm3 = vcmp.ne.s32.totalorder %v75_v22, 0  ;;  %vm103_vm4 = vcmp.lt.s32.totalorder %v75_v22, 0  ;;  %v109_v25 = vadd.s32 3, %v75_v22 }
  0x20   :  { %vm102_vm1 = vcmp.ne.s32.totalorder %v97_v20, 0  ;;  %vm105_vm2 = vcmp.lt.s32.totalorder %v97_v20, 0  ;;  %v111_v24 = vadd.s32 3, %v97_v20  ;;  %vm101_vm7 = vcmp.ne.s32.totalorder %v86_v23, 0  ;;  %vm106_vm9 = vmand %vm103_vm4, %vm100_vm3 }
  0x21   :  { %vm108_vm5 = vmand %vm105_vm2, %vm102_vm1  ;;  %vm104_vm8 = vcmp.lt.s32.totalorder %v86_v23, 0  ;;  %v110_v29 = vadd.s32 3, %v86_v23  ;;  %v112_v32 = vsel %vm106_vm9, %v109_v25, %v75_v22  ;;  %vm214_vm2 = vcmask 1040384  }
  0x22   :  { %v114_v27 = vsel %vm108_vm5, %v111_v24, %v97_v20  ;;  %vm107_vm10 = vmand %vm104_vm8, %vm101_vm7  ;;  %vm121_vm13 = vcmp.eq.s32.totalorder %v112_v32, 0  ;;  %vm130_vm15 = vcmp.eq.s32.totalorder %v112_v32, 1  ;;  %v209_v20 = vsub.s32 2, %v169_v63 }
  0x23   :  { %vm123_vm11 = vcmp.eq.s32.totalorder %v114_v27, 0  ;;  %vm132_vm12 = vcmp.eq.s32.totalorder %v114_v27, 1  ;;  %v113_v34 = vsel %vm107_vm10, %v110_v29, %v86_v23  ;;  %vm222_vm3 = vcmask 0  }
  0x24   :  { %vm122_vm14 = vcmp.eq.s32.totalorder %v113_v34, 0  ;;  %vm131_vm1 = vcmp.eq.s32.totalorder %v113_v34, 1 }
  0x85   :  { %v52_v26 = vpop.permute.xlu1 %51  ;;  %v48_v28 = vpop.permute.xlu0 %47 }
  0x86   :  { %v58_v30 = vsel %vm55_vm6, %v52_v26, %v48_v28 }
  0x87   :  { %v61_v31 = vsub.f32 %v46_v3, %v58_v30 }
  0x89   :  { %v64_v33 = vmul.f32 %v61_v31, %v61_v31  ;;  %v50_v35 = vpop.permute.xlu0 %49 }
  0x8a   :  { %v56_v36 = vsel %vm55_vm6, %v50_v35, %v52_v26  ;;  %v57_v37 = vsel %vm55_vm6, %v48_v28, %v50_v35 }
  0x8b   :  { %v129_v38 = vsel %vm123_vm11, %v64_v33, 0.0  ;;  %v138_v39 = vsel %vm132_vm12, %v64_v33, 0.0  ;;  %v59_v40 = vsub.f32 %v44_v4, %v57_v37  ;;  %v60_v41 = vsub.f32 %v45_v5, %v56_v36 }
  0x8c   :  { %v142_v42 = vsub.f32 %v129_v38, %v138_v39 }
  0x8d   :  { %v62_v43 = vmul.f32 %v59_v40, %v59_v40  ;;  %v63_v44 = vmul.f32 %v60_v41, %v60_v41 }
  0x8e   :  { %v155_v45 = vrot.slane %v142_v42, 4 }
  0x8f   :  { %v127_v46 = vsel %vm121_vm13, %v62_v43, 0.0  ;;  %v128_v47 = vsel %vm122_vm14, %v63_v44, 0.0  ;;  %v136_v48 = vsel %vm130_vm15, %v62_v43, 0.0  ;;  %v137_v49 = vsel %vm131_vm1, %v63_v44, 0.0 }
  0x90   :  { %v156_v50 = vadd.f32 %v155_v45, %v142_v42  ;;  %v140_v51 = vsub.f32 %v127_v46, %v136_v48  ;;  %v141_v52 = vsub.f32 %v128_v47, %v137_v49 }
  0x92   :  { %v157_v53 = vrot.slane %v156_v50, 2  ;;  %v143_v54 = vrot.slane %v140_v51, 4  ;;  %v149_v55 = vrot.slane %v141_v52, 4 }
  0x94   :  { %v158_v58 = vadd.f32 %v157_v53, %v156_v50  ;;  %v144_v59 = vadd.f32 %v143_v54, %v140_v51  ;;  %v150_v60 = vadd.f32 %v149_v55, %v141_v52 }
  0x96   :  { %v145_v61 = vrot.slane %v144_v59, 2  ;;  %v151_v62 = vrot.slane %v150_v60, 2  ;;  %v159_v3 = vrot.slane %v158_v58, 1 }
  0x98   :  { %v146_v4 = vadd.f32 %v145_v61, %v144_v59  ;;  %v152_v5 = vadd.f32 %v151_v62, %v150_v60  ;;  %v160_v9 = vadd.f32 %v159_v3, %v158_v58 }
  0x9a   :  { %v147_v6 = vrot.slane %v146_v4, 1  ;;  %v153_v7 = vrot.slane %v152_v5, 1  ;;  %v178_v13 = vrot.slane %v160_v9, %v170_v8 }
  0x9c   :  { %v148_v10 = vadd.f32 %v147_v6, %v146_v4  ;;  %v154_v11 = vadd.f32 %v153_v7, %v152_v5 }
  0x9e   :  { %v164_v12 = vcombine.low %v148_v10, %v154_v11 }
  0xa0   :  { %v171_v14 = vrot.slane %v164_v12, %v170_v8 }
  0xa2   :  { %v179_v15 = vcombine.low %v171_v14, %v178_v13 }
  0xa4   :  { %v186_v17 = vrot.slane %v179_v15, %v170_v8 }
  0xa6   :  { %v188_v18 = vadd.f32 %v186_v17, %v139_v16 }
  0xa8   :  { %193 = vst.msk [vmem:[#allocation2] sm:$0x7] %vm328_vm0, %v188_v18 }
  0xaf   :  { %v197_v21 = vld [vmem:[#allocation2] sm:$0x7] }
  0xb0   :  { %v202_v22 = vrot.slane %v197_v21, %v201_v0  ;;  %v206_v23 = vrot.slane %v197_v21, %v205_v19  ;;  %v210_v24 = vrot.slane %v197_v21, %v209_v20 }
  0xb2   :  { %v215_v25 = vsel %vm214_vm2, %v202_v22, 0.0  ;;  %v216_v26 = vsel %vm214_vm2, %v206_v23, 0.0  ;;  %v218_v28 = vsel %vm214_vm2, %v210_v24, 0.0 }
  0xb3   :  { %v217_v27 = vadd.f32 %v216_v26, %v215_v25 }
  0xb5   :  { %v219_v29 = vadd.f32 %v218_v28, %v217_v27 }
  0xb7   :  { %220 = vadd.xlane.f32.xlu1 %v219_v29 }
 0x144   :  { %v221_v1 = vpop.xlane.xlu1 %220 }
 0x145   :  { %223 = vst.msk [vmem:[#allocation6] sm:$0x1] %vm222_vm3, %v221_v1 }
 0x146   :  { %285 = shalt.err (!%p282_p12)
}
 0x147   :  { %s286_s24 = scalar_lea.hbm %s366_s1, 16 }
 0x148   :  { %p287_p13 = scmp.ne.s32.totalorder %s366_s1, %s286_s24  ;;  %p290_p0 = scmp.lt.u32.totalorder %s286_s24, %s366_s1 }
 0x14a   :  { %p292_p1 = pnand %p290_p0, %p287_p13 }
 0x14c   :  { %295 = shalt.err (!%p292_p1)
}
 0x14d   :  { %233 = dma.vmem_to_hbm [thread:$0]  %s231_s19, 16, %s366_s1, [#allocation5]  }
 0x14e   :  { %298 = dma.done.wait [#allocation5], 16  }
 0x14f   :  { %299 = vsyncadd [#allocation5], 4294967280 }
 0x150   :  { %237 = vsyncpa [#allocation4], 1 }
 0x151   :  { %238 = vsyncpa [#allocation5], 1 }

</bundles_post_ra>
